<compile_context>
chip_gen: v6e
topology: v6e:2x2x1
jax: 0.10.0
libtpu: 0.0.40
codegen_flags: <defaults>
</compile_context>

<pallas_src>
import functools

import jax
import jax.numpy as jnp
import numpy as np
from jax.experimental import pallas as pl
from jax.experimental.pallas import tpu as pltpu


def _round_up(x: int, m: int) -> int:
    return (x + m - 1) // m * m


def _cdiv(a: int, b: int) -> int:
    return -(-a // b)


def detection_head_kernel(x_ref, w1_ref, b1_ref, w2_ref, b2_ref, o_ref):
    # x arrives f32 straight from HBM (no wrapper pad/cast pass); cast to bf16
    # just before the MXU. Accumulate in f32, bias + relu in f32.
    x = x_ref[...].astype(jnp.bfloat16)
    h = jnp.dot(x, w1_ref[...], preferred_element_type=jnp.float32)
    h = jnp.maximum(h + b1_ref[...], 0.0)
    out = jnp.dot(h.astype(jnp.bfloat16), w2_ref[...],
                  preferred_element_type=jnp.float32)
    o_ref[...] = (out + b2_ref[...]).astype(o_ref.dtype)


def _choose_tile_b(B: int, requested: int, H: int) -> int:
    """Batch tile: multiple of 8, VMEM-friendly, minimal masked tail rows.
    Prefers >= 2 grid steps for large batches (v7x megacore)."""
    # Keep a single double-buffered f32 x tile at ~<= 4 MiB (8 MiB for 2 bufs).
    cap_rows = max(8, ((4 << 20) // max(1, 4 * H)) // 8 * 8)
    t = max(8, min(requested, cap_rows))
    if B <= t:
        if B >= 512:
            return _round_up(_cdiv(B, 2), 8)   # 2 steps so both v7x TCs work
        return B                                # one block == full batch dim
    steps = _cdiv(B, t)
    return _round_up(_cdiv(B, steps), 8)        # even tiles -> tiny tail waste


def prepare_params(w1, b1, w2, b2):
    """One-time conversion to kernel layout (hoisted out of the per-call path):
    bf16 weights stored (in, out), f32 biases shaped (1, N)."""
    hidden256 = w1.shape[1]
    out_dim = w2.shape[1]
    return (w1.astype(jnp.bfloat16),
            jnp.asarray(b1, jnp.float32).reshape(1, hidden256),
            w2.astype(jnp.bfloat16),
            jnp.asarray(b2, jnp.float32).reshape(1, out_dim))


@functools.partial(jax.jit, static_argnames=("tile_b",))
def detection_head(x, w1, b1, w2, b2, *, tile_b: int = 1024):
    """Pallas TPU DetectionHead forward.

    x : (B, hidden_size)              float32
    w1: (hidden_size, 256)            bf16 (use prepare_params)   b1: (1, 256) f32
    w2: (256, num_classes + 4)        bf16                        b2: (1, num_classes + 4) f32
    returns (B, num_classes + 4)      float32
    """
    B, H = x.shape
    hidden256 = w1.shape[1]            # 256
    out_dim = w2.shape[1]              # num_classes + 4

    # No-ops if caller already used prepare_params().
    w1 = w1.astype(jnp.bfloat16)
    w2 = w2.astype(jnp.bfloat16)
    b1 = jnp.asarray(b1, jnp.float32).reshape(1, hidden256)
    b2 = jnp.asarray(b2, jnp.float32).reshape(1, out_dim)

    tb = _choose_tile_b(B, tile_b, H)
    grid = (_cdiv(B, tb),)

    # Advisory cost for XLA scheduling around the custom call.
    w_bytes = (H * hidden256 + hidden256 * out_dim) * 2 + (hidden256 + out_dim) * 4
    cost = pl.CostEstimate(
        flops=2 * B * (H * hidden256 + hidden256 * out_dim),
        transcendentals=0,
        bytes_accessed=B * H * 4 + w_bytes + B * out_dim * 4,
    )

    # Explicit scoped-VMEM budget: enough for double-buffered tiles + resident
    # weights, capped below v7x's 64 MiB physical (fine on v5e/v6e 128 MiB).
    vmem_est = (2 * (tb * H * 4 + tb * out_dim * 4 + w_bytes)
                + tb * hidden256 * 4 + (2 << 20))
    vmem_limit = int(min(max(vmem_est, 32 << 20), 48 << 20))

    return pl.pallas_call(
        detection_head_kernel,
        out_shape=jax.ShapeDtypeStruct((B, out_dim), jnp.float32),
        grid=grid,
        in_specs=[
            pl.BlockSpec((tb, H), lambda i: (i, 0)),               # x tile (f32)
            pl.BlockSpec((H, hidden256), lambda i: (0, 0)),        # w1 resident
            pl.BlockSpec((1, hidden256), lambda i: (0, 0)),        # b1 resident
            pl.BlockSpec((hidden256, out_dim), lambda i: (0, 0)),  # w2 resident
            pl.BlockSpec((1, out_dim), lambda i: (0, 0)),          # b2 resident
        ],
        out_specs=pl.BlockSpec((tb, out_dim), lambda i: (i, 0)),   # exact (B, out_dim)
        compiler_params=pltpu.CompilerParams(
            dimension_semantics=("parallel",),
            vmem_limit_bytes=vmem_limit,
        ),
        cost_estimate=cost,
    )(x, w1, b1, w2, b2)


def init_params(key, hidden_size, num_classes):
    """Deterministic synthetic init mimicking nn.Linear's uniform(-1/sqrt(fan_in))."""
    k1, k2, k3, k4 = jax.random.split(key, 4)
    bound1 = 1.0 / np.sqrt(hidden_size)
    w1 = jax.random.uniform(k1, (hidden_size, 256), jnp.float32, -bound1, bound1)
    b1 = jax.random.uniform(k2, (1, 256), jnp.float32, -bound1, bound1)
    bound2 = 1.0 / np.sqrt(256)
    out_dim = num_classes + 4
    w2 = jax.random.uniform(k3, (256, out_dim), jnp.float32, -bound2, bound2)
    b2 = jax.random.uniform(k4, (1, out_dim), jnp.float32, -bound2, bound2)
    return w1, b1, w2, b2


if __name__ == "__main__":
    # Small shapes consistent with the module: (batch=2, hidden=32), num_classes=4.
    batch = 2
    hidden_size = 32
    num_classes = 4

    key = jax.random.PRNGKey(0)
    kx, kp = jax.random.split(key)
    x = jax.random.normal(kx, (batch, hidden_size), jnp.float32)
    w1, b1, w2, b2 = init_params(kp, hidden_size, num_classes)
    params = prepare_params(w1, b1, w2, b2)   # one-time kernel-layout cast

    out = detection_head(x, *params)
    out = jax.block_until_ready(out)

    # Pure-JAX f32 reference; tolerance accounts for bf16 MXU inputs.
    ref = jnp.maximum(x @ w1 + b1, 0.0) @ w2 + b2
    np.testing.assert_allclose(np.asarray(out), np.asarray(ref), rtol=2e-2, atol=2e-2)
    assert out.shape == (batch, num_classes + 4)

    # Second sanity check: multi-step grid with an uneven (masked) tail block.
    batch2, hidden2, classes2 = 520, 96, 17
    k2x, k2p = jax.random.split(jax.random.PRNGKey(1))
    x2 = jax.random.normal(k2x, (batch2, hidden2), jnp.float32)
    w1b, b1b, w2b, b2b = init_params(k2p, hidden2, classes2)
    out2 = detection_head(x2, *prepare_params(w1b, b1b, w2b, b2b), tile_b=256)
    out2 = jax.block_until_ready(out2)
    ref2 = jnp.maximum(x2 @ w1b + b1b, 0.0) @ w2b + b2b
    np.testing.assert_allclose(np.asarray(out2), np.asarray(ref2), rtol=2e-2, atol=2e-2)
    assert out2.shape == (batch2, classes2 + 4)

    print("KERNEL_OK")
</pallas_src>

<mosaic_0001>
module attributes {stable_mosaic.version = 11 : i64} {
  func.func @detection_head_kernel(%arg0: i32, %arg1: memref<2x32xf32, #tpu.memory_space<vmem>>, %arg2: memref<32x256xbf16, #tpu.memory_space<vmem>>, %arg3: memref<1x256xf32, #tpu.memory_space<vmem>>, %arg4: memref<256x8xbf16, #tpu.memory_space<vmem>>, %arg5: memref<1x8xf32, #tpu.memory_space<vmem>>, %arg6: memref<2x8xf32, #tpu.memory_space<vmem>>) attributes {dimension_semantics = [#tpu.dimension_semantics<parallel>], iteration_bounds = array<i64: 1>, scalar_prefetch = 0 : i64, scratch_operands = 0 : i64, tpu.core_type = #tpu.core_type<tc>, window_params = [{transform_indices = @transform_0, window_bounds = array<i64: 2, 32>}, {pipeline_mode = #tpu.pipeline_mode<synchronous>, transform_indices = @transform_1, window_bounds = array<i64: 32, 256>}, {pipeline_mode = #tpu.pipeline_mode<synchronous>, transform_indices = @transform_2, window_bounds = array<i64: 1, 256>}, {pipeline_mode = #tpu.pipeline_mode<synchronous>, transform_indices = @transform_3, window_bounds = array<i64: 256, 8>}, {pipeline_mode = #tpu.pipeline_mode<synchronous>, transform_indices = @transform_4, window_bounds = array<i64: 1, 8>}, {transform_indices = @transform_5, window_bounds = array<i64: 2, 8>}]} {
    %c0 = arith.constant 0 : index
    %c0_0 = arith.constant 0 : index
    %0 = vector.load %arg1[%c0, %c0_0] : memref<2x32xf32, #tpu.memory_space<vmem>>, vector<2x32xf32>
    %1 = arith.truncf %0 : vector<2x32xf32> to vector<2x32xbf16>
    %c0_1 = arith.constant 0 : index
    %c0_2 = arith.constant 0 : index
    %2 = vector.load %arg2[%c0_1, %c0_2] : memref<32x256xbf16, #tpu.memory_space<vmem>>, vector<32x256xbf16>
    %cst = arith.constant dense<0.000000e+00> : vector<2x256xf32>
    %3 = tpu.matmul %1, %2, %cst {dimension_numbers = #tpu.dot_dimension_numbers<[1], [0], [0], [1], [0, 0, 1, 1], [], []>} : vector<2x32xbf16>, vector<32x256xbf16>, vector<2x256xf32> -> vector<2x256xf32>
    %c0_3 = arith.constant 0 : index
    %c0_4 = arith.constant 0 : index
    %4 = vector.load %arg3[%c0_3, %c0_4] : memref<1x256xf32, #tpu.memory_space<vmem>>, vector<1x256xf32>
    %5 = vector.broadcast %4 : vector<1x256xf32> to vector<2x256xf32>
    %6 = arith.addf %3, %5 : vector<2x256xf32>
    %cst_5 = arith.constant 0.000000e+00 : f32
    %7 = vector.broadcast %cst_5 : f32 to vector<2x256xf32>
    %8 = arith.maximumf %6, %7 : vector<2x256xf32>
    %9 = arith.truncf %8 : vector<2x256xf32> to vector<2x256xbf16>
    %c0_6 = arith.constant 0 : index
    %c0_7 = arith.constant 0 : index
    %10 = vector.load %arg4[%c0_6, %c0_7] : memref<256x8xbf16, #tpu.memory_space<vmem>>, vector<256x8xbf16>
    %cst_8 = arith.constant dense<0.000000e+00> : vector<2x8xf32>
    %11 = tpu.matmul %9, %10, %cst_8 {dimension_numbers = #tpu.dot_dimension_numbers<[1], [0], [0], [1], [0, 0, 1, 1], [], []>} : vector<2x256xbf16>, vector<256x8xbf16>, vector<2x8xf32> -> vector<2x8xf32>
    %c0_9 = arith.constant 0 : index
    %c0_10 = arith.constant 0 : index
    %12 = vector.load %arg5[%c0_9, %c0_10] : memref<1x8xf32, #tpu.memory_space<vmem>>, vector<1x8xf32>
    %13 = vector.broadcast %12 : vector<1x8xf32> to vector<2x8xf32>
    %14 = arith.addf %11, %13 : vector<2x8xf32>
    %c0_11 = arith.constant 0 : index
    %c0_12 = arith.constant 0 : index
    %15 = vector.load %arg6[%c0_11, %c0_12] : memref<2x8xf32, #tpu.memory_space<vmem>>, vector<2x8xf32>
    tpu.vector_store %arg6[%c0_11, %c0_12], %14 {strides = array<i32>} : memref<2x8xf32, #tpu.memory_space<vmem>>, vector<2x8xf32>,
    return
  }
  func.func @transform_0(%arg0: i32) -> (i32, i32) {
    %c0_i32 = arith.constant 0 : i32
    %c0_i32_0 = arith.constant 0 : i32
    return %arg0, %c0_i32 : i32, i32
  }
  func.func @transform_1(%arg0: i32) -> (i32, i32) {
    %c0_i32 = arith.constant 0 : i32
    %c0_i32_0 = arith.constant 0 : i32
    %c0_i32_1 = arith.constant 0 : i32
    return %c0_i32, %c0_i32_0 : i32, i32
  }
  func.func @transform_2(%arg0: i32) -> (i32, i32) {
    %c0_i32 = arith.constant 0 : i32
    %c0_i32_0 = arith.constant 0 : i32
    %c0_i32_1 = arith.constant 0 : i32
    return %c0_i32, %c0_i32_0 : i32, i32
  }
  func.func @transform_3(%arg0: i32) -> (i32, i32) {
    %c0_i32 = arith.constant 0 : i32
    %c0_i32_0 = arith.constant 0 : i32
    %c0_i32_1 = arith.constant 0 : i32
    return %c0_i32, %c0_i32_0 : i32, i32
  }
  func.func @transform_4(%arg0: i32) -> (i32, i32) {
    %c0_i32 = arith.constant 0 : i32
    %c0_i32_0 = arith.constant 0 : i32
    %c0_i32_1 = arith.constant 0 : i32
    return %c0_i32, %c0_i32_0 : i32, i32
  }
  func.func @transform_5(%arg0: i32) -> (i32, i32) {
    %c0_i32 = arith.constant 0 : i32
    %c0_i32_0 = arith.constant 0 : i32
    return %arg0, %c0_i32 : i32, i32
  }
}

</mosaic_0001>

<bundles_post_ra>
// kernel: detection_head.1
= control target key start
LH: loop header
LB: loop body
LE: loop exit
PB: predicated region body
PF: predicated region fallthrough
CT: control target
= control target key end

     0   :  { %v390_v2 = vmov 0   ;;  %vm60_vm0 = vcmask 261120   ;;  %s494_s0 = inlined_call_operand.vmem [shape: f32[2,32], index: 0, kind: input, shape index: {}]   ;;  %s495_s1 = inlined_call_operand.vmem [shape: bf16[32,256], index: 1, kind: input, shape index: {}]   ;;  %s496_s2 = inlined_call_operand.vmem [shape: f32[1,256], index: 2, kind: input, shape index: {}]   ;;  %s497_s3 = inlined_call_operand.vmem [shape: bf16[256,8], index: 3, kind: input, shape index: {}]   ;;  %s498_s4 = inlined_call_operand.vmem [shape: f32[1,8], index: 4, kind: input, shape index: {}]   ;;  %s499_s5 = inlined_call_operand.hbm [shape: f32[2,8], index: 5, kind: output, shape index: {}]  }
   0x1   :  { %v346_v0 = vld [vmem:[%s495_s1 + $0x14] ss:$8 sps:$4 sm:$0xff]   ;;  %v348_v1 = vld [vmem:[%s495_s1 + $0x10] ss:$8 sps:$4 sm:$0xff]   ;;  %96 = vmatprep.mubr.bf16.mxu0 %v390_v2  ;;  %v349_v3 = vld [vmem:[%s495_s1 + $0x4] ss:$8 sps:$4 sm:$0xff]  }
   0x2   :  { %76 = vmatprep.subr.bf16.mxu0 %v346_v0  ;;  %v351_v4 = vld [vmem:[%s495_s1] ss:$8 sps:$4 sm:$0xff]   ;;  %v352_v6 = vld [vmem:[%s497_s3 + $0x78] sm:$0xff]   ;;  %v354_v8 = vld [vmem:[%s497_s3 + $0x70] sm:$0xff]  }
   0x3   :  { %v22_v5 = vld [vmem:[%s494_s0] sm:$0x3]  ;;  %77 = vmatpush1.bf16.msra.mxu0 %v348_v1  ;;  %v353_v7 = vld [vmem:[%s497_s3 + $0x38] sm:$0xff]   ;;  %322 = vmatprep.subr.bf16.mxu1 %v352_v6  ;;  %v355_v10 = vld [vmem:[%s497_s3 + $0x30] sm:$0xff]  }
   0x4   :  { %78 = vmatprep.subr.bf16.mxu0 %v349_v3  ;;  %v23_v9 = vpack.c.bf16 %v22_v5, %v22_v5  ;;  %323 = vmatpush3.bf16.msra.mxu1 %v353_v7  ;;  %v356_v11 = vld [vmem:[%s497_s3 + $0x68] sm:$0xff]   ;;  %v358_v13 = vld [vmem:[%s497_s3 + $0x60] sm:$0xff]   ;;  %v360_v15 = vld [vmem:[%s497_s3 + $0x58] sm:$0xff]  }
   0x5   :  { %324 = vmatprep.subr.bf16.mxu1 %v354_v8  ;;  %v357_v12 = vld [vmem:[%s497_s3 + $0x28] sm:$0xff]   ;;  %v359_v14 = vld [vmem:[%s497_s3 + $0x20] sm:$0xff]   ;;  %v361_v16 = vld [vmem:[%s497_s3 + $0x18] sm:$0xff]  }
   0x7   :  { %79 = vmatpush1.bf16.msra.mxu0 %v351_v4 }
   0x8   :  { %325 = vmatpush3.bf16.msra.mxu1 %v355_v10 }
   0x9   :  { %326 = vmatprep.subr.bf16.mxu1 %v356_v11 }
   0xa   :  { %304 = vmatmul.mubr.msk.bf16.vlgmr.msra.gmra.mxu0 %vm60_vm0, %v23_v9 }
   0xc   :  { %327 = vmatpush3.bf16.msra.mxu1 %v357_v12 }
   0xd   :  { %328 = vmatprep.subr.bf16.mxu1 %v358_v13 }
  0x10   :  { %329 = vmatpush3.bf16.msra.mxu1 %v359_v14 }
  0x11   :  { %10 = vsyncpa [#allocation3], 0  ;;  %330 = vmatprep.subr.bf16.mxu1 %v360_v15  ;;  %v362_v17 = vld [vmem:[%s497_s3 + $0x50] sm:$0xff]   ;;  %v364_v19 = vld [vmem:[%s497_s3 + $0x48] sm:$0xff]   ;;  %v30_v23 = vlaneseq  ;;  %vm284_vm1 = vcmask 58368  }
  0x12   :  { %v363_v18 = vld [vmem:[%s497_s3 + $0x10] sm:$0xff]   ;;  %v365_v20 = vld [vmem:[%s497_s3 + $0x8] sm:$0xff]   ;;  %v366_v21 = vld [vmem:[%s497_s3 + $0x40] sm:$0xff]  }
  0x13   :  { %v367_v22 = vld [vmem:[%s497_s3] sm:$0xff]   ;;  %v31_v24 = vshrl.u32 %v30_v23, 7 }
  0x14   :  { %331 = vmatpush3.bf16.msra.mxu1 %v361_v16  ;;  %v28_v26 = vld [vmem:[%s496_s2] sm:$0x3]  ;;  %s391_s2 = smov [#allocation2]  }
  0x15   :  { %332 = vmatprep.subr.bf16.mxu1 %v362_v17  ;;  %v32_v25 = vsub.s32 0, %v31_v24  ;;  %v36_v27 = vsub.s32 1, %v31_v24  ;;  %v305_v41 = vld [vmem:[%s498_s4] ss:$0 sm:$0xff]  ;;  %s292_s0 = sshll.u32 %s391_s2, 4  ;;  %s293_s0 = int_to_ptr.vmem [resolvable:$true] %s292_s0 }
  0x16   :  { %s368_s10 = scalar_lea.vmem %s293_s0, 32  ;;  %p373_p1 = scmp.lt.s32.totalorder %s293_s0, %s293_s0 }
  0x17   :  { %v33_v28 = vrot.slane %v28_v26, %v32_v25  ;;  %v37_v29 = vrot.slane %v28_v26, %v36_v27  ;;  %p369_p0 = scmp.ne.s32.totalorder %s293_s0, %s368_s10  ;;  %p374_p2 = scmp.lt.s32.totalorder %s368_s10, %s368_s10 }
  0x18   :  { %333 = vmatpush3.bf16.msra.mxu1 %v363_v18 }
  0x19   :  { %334 = vmatprep.subr.bf16.mxu1 %v364_v19  ;;  %p375_p3 = por %p374_p2, %p373_p1 }
  0x1b   :  { %p376_p4 = pnand %p375_p3, %p369_p0 }
  0x1c   :  { %335 = vmatpush3.bf16.msra.mxu1 %v365_v20 }
  0x1d   :  { %336 = vmatprep.subr.bf16.mxu1 %v366_v21 }
  0x20   :  { %337 = vmatpush3.bf16.msra.mxu1 %v367_v22 }
  0xca   :  { %v98_v30 = vpop.f32.mrf.mxu0 }
  0xcb   :  { %v99_v31 = vadd.f32 %v98_v30, %v33_v28 }
  0xcc   :  { %v100_v32 = vpop.f32.mrf.mxu0 }
  0xcd   :  { %v101_v33 = vadd.f32 %v100_v32, %v37_v29  ;;  %v105_v34 = vmax.f32 %v99_v31, 0.0 }
  0xce   :  { %v102_v35 = vpop.f32.mrf.mxu0 }
  0xcf   :  { %v106_v36 = vmax.f32 %v101_v33, 0.0  ;;  %v107_v39 = vpack.c.bf16 %v105_v34, %v105_v34 }
  0xd0   :  { %v103_v37 = vpop.f32.mrf.mxu0 }
  0xd1   :  { %v108_v38 = vpack.c.bf16 %v106_v36, %v106_v36 }
  0xd3   :  { %276 = vmatprep.mubr.bf16.mxu1 %v108_v38 }
  0xd4   :  { %277 = vmatmul.mubr.bf16.vlgmr.msra.gmra.mxu1 %v107_v39 }
 0x194   :  { %v338_v40 = vpop.f32.mrf.mxu1 }
 0x196   :  { %v339_v42 = vpop.f32.mrf.mxu1 }
 0x197   :  { %v340_v43 = vadd.f32 %v339_v42, %v338_v40 }
 0x198   :  { %v341_v44 = vpop.f32.mrf.mxu1 }
 0x199   :  { %v279_v45 = vadd.f32 %v340_v43, %v305_v41 }
 0x19a   :  { %v342_v46 = vpop.f32.mrf.mxu1 }
 0x19b   :  { %285 = vst.msk [vmem:[#allocation2] sm:$0x3] %vm284_vm1, %v279_v45 }
 0x19c   :  { %379 = shalt.err (!%p376_p4)
}
 0x19d   :  { %295 = dma.vmem_to_hbm [thread:$0]  %s293_s0, 32, %s499_s5, [#allocation3]  }
 0x19e   :  { %388 = dma.done.wait [#allocation3], 32  }
 0x19f   :  { %389 = vsyncadd [#allocation3], 4294967264 }
 0x1a0   :  { %299 = vsyncpa [#allocation3], 1 }

</bundles_post_ra>
